<compile_context>
chip_gen: v7x
topology: tpu7x:2x2x1
jax: 0.10.0
libtpu: 0.0.40
codegen_flags: <defaults>
</compile_context>

<pallas_src>
import jax
import jax.numpy as jnp
from jax.experimental import pallas as pl
from jax.experimental.pallas import tpu as pltpu


def _round_up(x, m):
    return (x + m - 1) // m * m


def _fused_clip_kernel(x_ref, wv_ref, bv_ref, txt_ref, wt_ref, bt_ref,
                       img_out_ref, txt_out_ref, acc_ref):
    """grid = (batch_tiles, k_tiles); k (reduction over F) is the last axis.

    x:   [bm, tk]  bf16   (flattened image tile)
    wv:  [tk, Dp]  bf16   (vision weight K-tile)
    bv:  [1,  Dp]  f32
    txt: [bm, E]   bf16   (mean-pooled token embeddings)
    wt:  [E,  Dp]  bf16
    bt:  [1,  Dp]  f32
    outs: [bm, Dp] f32 ; acc: [bm, Dp] f32 scratch
    """
    k = pl.program_id(1)

    @pl.when(k == 0)
    def _init():
        acc_ref[...] = jnp.zeros_like(acc_ref)

    # K-tiled vision matmul on the MXU (bf16 inputs, f32 accumulation).
    acc_ref[...] += jnp.dot(x_ref[...], wv_ref[...],
                            preferred_element_type=jnp.float32)

    @pl.when(k == pl.num_programs(1) - 1)
    def _finalize():
        # Vision branch: bias + L2 normalize over the (zero-padded) feature dim.
        feat = acc_ref[...] + bv_ref[...]
        # 1e-30 floor only protects zero-padded batch rows from 0*inf=NaN; for
        # real rows rsqrt(max(s, 1e-30)) == rsqrt(s) bit-exactly (matches torch).
        inv = jax.lax.rsqrt(
            jnp.maximum(jnp.sum(feat * feat, axis=1, keepdims=True), 1e-30))
        img_out_ref[...] = (feat * inv).astype(img_out_ref.dtype)

        # Text branch (tiny): linear + L2 normalize, done once per batch tile.
        tfeat = jnp.dot(txt_ref[...], wt_ref[...],
                        preferred_element_type=jnp.float32) + bt_ref[...]
        tinv = jax.lax.rsqrt(
            jnp.maximum(jnp.sum(tfeat * tfeat, axis=1, keepdims=True), 1e-30))
        txt_out_ref[...] = (tfeat * tinv).astype(txt_out_ref.dtype)


def custom_model_forward(images, tokens, params, *, tk=512):
    """Pallas equivalent of CustomModel.forward.

    images: [B, C, H, W] f32 (NCHW), tokens: [B, L] int32.
    Returns (image_features, text_features), both [B, D], L2-normalized.
    """
    B = images.shape[0]
    F = images.shape[1] * images.shape[2] * images.shape[3]
    D = params["w_v"].shape[1]
    E = params["emb"].shape[1]

    # --- plain-JAX glue (fused by XLA): flatten image, gather + mean-pool text ---
    x = images.reshape(B, F)
    emb = jnp.take(params["emb"], tokens, axis=0)        # [B, L, E]
    pooled = jnp.mean(emb, axis=1)                       # [B, E]

    # --- padding for lane/sublane density + K tiling ---
    bm = 128 if B >= 128 else _round_up(B, 8)            # batch tile (sublane-aligned)
    B_pad = _round_up(B, bm)
    D_pad = _round_up(D, 128)                            # lane-dense output
    F_pad = _round_up(F, 128)
    tk = min(tk, F_pad)
    F_pad = _round_up(F_pad, tk)
    num_b = B_pad // bm
    num_k = F_pad // tk

    f32, bf16 = jnp.float32, jnp.bfloat16
    x_p = jnp.zeros((B_pad, F_pad), bf16).at[:B, :F].set(x.astype(bf16))
    wv_p = jnp.zeros((F_pad, D_pad), bf16).at[:F, :D].set(params["w_v"].astype(bf16))
    bv_p = jnp.zeros((1, D_pad), f32).at[:, :D].set(params["b_v"])
    txt_p = jnp.zeros((B_pad, E), bf16).at[:B, :].set(pooled.astype(bf16))
    wt_p = jnp.zeros((E, D_pad), bf16).at[:, :D].set(params["w_t"].astype(bf16))
    bt_p = jnp.zeros((1, D_pad), f32).at[:, :D].set(params["b_t"])

    img_p, txt_out_p = pl.pallas_call(
        _fused_clip_kernel,
        out_shape=(jax.ShapeDtypeStruct((B_pad, D_pad), f32),
                   jax.ShapeDtypeStruct((B_pad, D_pad), f32)),
        grid_spec=pltpu.PrefetchScalarGridSpec(
            num_scalar_prefetch=0,
            grid=(num_b, num_k),
            in_specs=[
                pl.BlockSpec((bm, tk), lambda b, k: (b, k)),        # x
                pl.BlockSpec((tk, D_pad), lambda b, k: (k, 0)),     # w_v
                pl.BlockSpec((1, D_pad), lambda b, k: (0, 0)),      # b_v
                pl.BlockSpec((bm, E), lambda b, k: (b, 0)),         # pooled text
                pl.BlockSpec((E, D_pad), lambda b, k: (0, 0)),      # w_t
                pl.BlockSpec((1, D_pad), lambda b, k: (0, 0)),      # b_t
            ],
            out_specs=[
                pl.BlockSpec((bm, D_pad), lambda b, k: (b, 0)),     # image features
                pl.BlockSpec((bm, D_pad), lambda b, k: (b, 0)),     # text features
            ],
            scratch_shapes=[pltpu.VMEM((bm, D_pad), jnp.float32)],
        ),
        compiler_params=pltpu.CompilerParams(
            dimension_semantics=("parallel", "arbitrary"),
            vmem_limit_bytes=32 * 1024 * 1024,
        ),
    )(x_p, wv_p, bv_p, txt_p, wt_p, bt_p)

    return img_p[:B, :D], txt_out_p[:B, :D]


def _reference(images, tokens, params):
    """Pure-JAX f32 reference for correctness checking."""
    B = images.shape[0]
    x = images.reshape(B, -1)
    img = x @ params["w_v"] + params["b_v"]
    img = img / jnp.linalg.norm(img, axis=1, keepdims=True)
    pooled = jnp.take(params["emb"], tokens, axis=0).mean(axis=1)
    txt = pooled @ params["w_t"] + params["b_t"]
    txt = txt / jnp.linalg.norm(txt, axis=1, keepdims=True)
    return img, txt


if __name__ == "__main__":
    # Small deterministic shapes.
    B, C, H, W = 2, 4, 16, 16          # images: [2, 4, 16, 16] NCHW
    L, VOCAB, E = 8, 64, 32            # tokens: [2, 8]
    D = 32                             # shared embedding dim
    F = C * H * W

    key = jax.random.PRNGKey(0)
    k_img, k_tok, k_wv, k_bv, k_emb, k_wt, k_bt = jax.random.split(key, 7)

    images = jax.random.normal(k_img, (B, C, H, W), dtype=jnp.float32)
    tokens = jax.random.randint(k_tok, (B, L), 0, VOCAB, dtype=jnp.int32)

    params = {
        "w_v": jax.random.normal(k_wv, (F, D), dtype=jnp.float32) * 0.02,
        "b_v": jax.random.normal(k_bv, (1, D), dtype=jnp.float32) * 0.02,
        "emb": jax.random.normal(k_emb, (VOCAB, E), dtype=jnp.float32) * 0.02,
        "w_t": jax.random.normal(k_wt, (E, D), dtype=jnp.float32) * 0.02,
        "b_t": jax.random.normal(k_bt, (1, D), dtype=jnp.float32) * 0.02,
    }

    img_feat, txt_feat = jax.jit(custom_model_forward)(images, tokens, params)
    jax.block_until_ready((img_feat, txt_feat))

    # sanity: shapes + unit-norm along dim=1 (normalization is done in f32)
    assert img_feat.shape == (B, D) and txt_feat.shape == (B, D)
    assert jnp.allclose(jnp.linalg.norm(img_feat, axis=1), 1.0, atol=1e-4)
    assert jnp.allclose(jnp.linalg.norm(txt_feat, axis=1), 1.0, atol=1e-4)

    # numerical check vs. f32 reference (loose tolerance for bf16 matmul inputs)
    ref_img, ref_txt = _reference(images, tokens, params)
    assert jnp.allclose(img_feat, ref_img, atol=2e-2)
    assert jnp.allclose(txt_feat, ref_txt, atol=2e-2)

    print("KERNEL_OK")
</pallas_src>

<mosaic_0001>
module attributes {stable_mosaic.version = 11 : i64} {
  func.func @_fused_clip_kernel(%arg0: i32, %arg1: i32, %arg2: memref<8x512xbf16, #tpu.memory_space<vmem>>, %arg3: memref<512x128xbf16, #tpu.memory_space<vmem>>, %arg4: memref<1x128xf32, #tpu.memory_space<vmem>>, %arg5: memref<8x32xbf16, #tpu.memory_space<vmem>>, %arg6: memref<32x128xbf16, #tpu.memory_space<vmem>>, %arg7: memref<1x128xf32, #tpu.memory_space<vmem>>, %arg8: memref<8x128xf32, #tpu.memory_space<vmem>>, %arg9: memref<8x128xf32, #tpu.memory_space<vmem>>, %arg10: memref<8x128xf32, #tpu.memory_space<vmem>>) attributes {dimension_semantics = [#tpu.dimension_semantics<parallel>, #tpu.dimension_semantics<arbitrary>], iteration_bounds = array<i64: 1, 2>, scalar_prefetch = 0 : i64, scratch_operands = 1 : i64, tpu.core_type = #tpu.core_type<tc>, window_params = [{transform_indices = @transform_0, window_bounds = array<i64: 8, 512>}, {transform_indices = @transform_1, window_bounds = array<i64: 512, 128>}, {pipeline_mode = #tpu.pipeline_mode<synchronous>, transform_indices = @transform_2, window_bounds = array<i64: 1, 128>}, {transform_indices = @transform_3, window_bounds = array<i64: 8, 32>}, {pipeline_mode = #tpu.pipeline_mode<synchronous>, transform_indices = @transform_4, window_bounds = array<i64: 32, 128>}, {pipeline_mode = #tpu.pipeline_mode<synchronous>, transform_indices = @transform_5, window_bounds = array<i64: 1, 128>}, {transform_indices = @transform_6, window_bounds = array<i64: 8, 128>}, {transform_indices = @transform_7, window_bounds = array<i64: 8, 128>}]} {
    %c0_i32 = arith.constant 0 : i32
    %0 = arith.cmpi eq, %arg1, %c0_i32 : i32
    %1 = arith.extui %0 : i1 to i32
    %c0_i32_0 = arith.constant 0 : i32
    %2 = arith.cmpi ne, %1, %c0_i32_0 : i32
    scf.if %2 {
      %cst_9 = arith.constant 0.000000e+00 : f32
      %12 = vector.broadcast %cst_9 : f32 to vector<8x128xf32>
      %c0_10 = arith.constant 0 : index
      %c0_11 = arith.constant 0 : index
      %13 = vector.load %arg10[%c0_10, %c0_11] : memref<8x128xf32, #tpu.memory_space<vmem>>, vector<8x128xf32>
      tpu.vector_store %arg10[%c0_10, %c0_11], %12 {strides = array<i32>} : memref<8x128xf32, #tpu.memory_space<vmem>>, vector<8x128xf32>,
    } else {
    }
    %c0 = arith.constant 0 : index
    %c0_1 = arith.constant 0 : index
    %3 = vector.load %arg10[%c0, %c0_1] : memref<8x128xf32, #tpu.memory_space<vmem>>, vector<8x128xf32>
    %c0_2 = arith.constant 0 : index
    %c0_3 = arith.constant 0 : index
    %4 = vector.load %arg2[%c0_2, %c0_3] : memref<8x512xbf16, #tpu.memory_space<vmem>>, vector<8x512xbf16>
    %c0_4 = arith.constant 0 : index
    %c0_5 = arith.constant 0 : index
    %5 = vector.load %arg3[%c0_4, %c0_5] : memref<512x128xbf16, #tpu.memory_space<vmem>>, vector<512x128xbf16>
    %cst = arith.constant dense<0.000000e+00> : vector<8x128xf32>
    %6 = tpu.matmul %4, %5, %cst {dimension_numbers = #tpu.dot_dimension_numbers<[1], [0], [0], [1], [0, 0, 1, 1], [], []>} : vector<8x512xbf16>, vector<512x128xbf16>, vector<8x128xf32> -> vector<8x128xf32>
    %7 = arith.addf %3, %6 : vector<8x128xf32>
    %c0_6 = arith.constant 0 : index
    %c0_7 = arith.constant 0 : index
    %8 = vector.load %arg10[%c0_6, %c0_7] : memref<8x128xf32, #tpu.memory_space<vmem>>, vector<8x128xf32>
    tpu.vector_store %arg10[%c0_6, %c0_7], %7 {strides = array<i32>} : memref<8x128xf32, #tpu.memory_space<vmem>>, vector<8x128xf32>,
    %c1_i32 = arith.constant 1 : i32
    %9 = arith.cmpi eq, %arg1, %c1_i32 : i32
    %10 = arith.extui %9 : i1 to i32
    %c0_i32_8 = arith.constant 0 : i32
    %11 = arith.cmpi ne, %10, %c0_i32_8 : i32
    scf.if %11 {
      %c0_9 = arith.constant 0 : index
      %c0_10 = arith.constant 0 : index
      %12 = vector.load %arg10[%c0_9, %c0_10] : memref<8x128xf32, #tpu.memory_space<vmem>>, vector<8x128xf32>
      %c0_11 = arith.constant 0 : index
      %c0_12 = arith.constant 0 : index
      %13 = vector.load %arg4[%c0_11, %c0_12] : memref<1x128xf32, #tpu.memory_space<vmem>>, vector<1x128xf32>
      %14 = vector.broadcast %13 : vector<1x128xf32> to vector<8x128xf32>
      %15 = arith.addf %12, %14 : vector<8x128xf32>
      %16 = arith.mulf %15, %15 : vector<8x128xf32>
      %cst_13 = arith.constant dense<0.000000e+00> : vector<8xf32>
      %17 = vector.multi_reduction <add>, %16, %cst_13 [1] : vector<8x128xf32> to vector<8xf32>
      %18 = vector.shape_cast %17 : vector<8xf32> to vector<8x1xf32>
      %cst_14 = arith.constant 1.000000e-30 : f32
      %19 = vector.broadcast %cst_14 : f32 to vector<8x1xf32>
      %20 = arith.maximumf %18, %19 : vector<8x1xf32>
      %21 = math.rsqrt %20 : vector<8x1xf32>
      %22 = vector.broadcast %21 : vector<8x1xf32> to vector<8x128xf32>
      %23 = arith.mulf %15, %22 : vector<8x128xf32>
      %c0_15 = arith.constant 0 : index
      %c0_16 = arith.constant 0 : index
      %24 = vector.load %arg8[%c0_15, %c0_16] : memref<8x128xf32, #tpu.memory_space<vmem>>, vector<8x128xf32>
      tpu.vector_store %arg8[%c0_15, %c0_16], %23 {strides = array<i32>} : memref<8x128xf32, #tpu.memory_space<vmem>>, vector<8x128xf32>,
      %c0_17 = arith.constant 0 : index
      %c0_18 = arith.constant 0 : index
      %25 = vector.load %arg5[%c0_17, %c0_18] : memref<8x32xbf16, #tpu.memory_space<vmem>>, vector<8x32xbf16>
      %c0_19 = arith.constant 0 : index
      %c0_20 = arith.constant 0 : index
      %26 = vector.load %arg6[%c0_19, %c0_20] : memref<32x128xbf16, #tpu.memory_space<vmem>>, vector<32x128xbf16>
      %cst_21 = arith.constant dense<0.000000e+00> : vector<8x128xf32>
      %27 = tpu.matmul %25, %26, %cst_21 {dimension_numbers = #tpu.dot_dimension_numbers<[1], [0], [0], [1], [0, 0, 1, 1], [], []>} : vector<8x32xbf16>, vector<32x128xbf16>, vector<8x128xf32> -> vector<8x128xf32>
      %c0_22 = arith.constant 0 : index
      %c0_23 = arith.constant 0 : index
      %28 = vector.load %arg7[%c0_22, %c0_23] : memref<1x128xf32, #tpu.memory_space<vmem>>, vector<1x128xf32>
      %29 = vector.broadcast %28 : vector<1x128xf32> to vector<8x128xf32>
      %30 = arith.addf %27, %29 : vector<8x128xf32>
      %31 = arith.mulf %30, %30 : vector<8x128xf32>
      %cst_24 = arith.constant dense<0.000000e+00> : vector<8xf32>
      %32 = vector.multi_reduction <add>, %31, %cst_24 [1] : vector<8x128xf32> to vector<8xf32>
      %33 = vector.shape_cast %32 : vector<8xf32> to vector<8x1xf32>
      %cst_25 = arith.constant 1.000000e-30 : f32
      %34 = vector.broadcast %cst_25 : f32 to vector<8x1xf32>
      %35 = arith.maximumf %33, %34 : vector<8x1xf32>
      %36 = math.rsqrt %35 : vector<8x1xf32>
      %37 = vector.broadcast %36 : vector<8x1xf32> to vector<8x128xf32>
      %38 = arith.mulf %30, %37 : vector<8x128xf32>
      %c0_26 = arith.constant 0 : index
      %c0_27 = arith.constant 0 : index
      %39 = vector.load %arg9[%c0_26, %c0_27] : memref<8x128xf32, #tpu.memory_space<vmem>>, vector<8x128xf32>
      tpu.vector_store %arg9[%c0_26, %c0_27], %38 {strides = array<i32>} : memref<8x128xf32, #tpu.memory_space<vmem>>, vector<8x128xf32>,
    } else {
    }
    return
  }
  func.func @transform_0(%arg0: i32, %arg1: i32) -> (i32, i32) {
    %c0_i32 = arith.constant 0 : i32
    return %arg0, %arg1 : i32, i32
  }
  func.func @transform_1(%arg0: i32, %arg1: i32) -> (i32, i32) {
    %c0_i32 = arith.constant 0 : i32
    %c0_i32_0 = arith.constant 0 : i32
    return %arg1, %c0_i32 : i32, i32
  }
  func.func @transform_2(%arg0: i32, %arg1: i32) -> (i32, i32) {
    %c0_i32 = arith.constant 0 : i32
    %c0_i32_0 = arith.constant 0 : i32
    %c0_i32_1 = arith.constant 0 : i32
    return %c0_i32, %c0_i32_0 : i32, i32
  }
  func.func @transform_3(%arg0: i32, %arg1: i32) -> (i32, i32) {
    %c0_i32 = arith.constant 0 : i32
    %c0_i32_0 = arith.constant 0 : i32
    return %arg0, %c0_i32 : i32, i32
  }
  func.func @transform_4(%arg0: i32, %arg1: i32) -> (i32, i32) {
    %c0_i32 = arith.constant 0 : i32
    %c0_i32_0 = arith.constant 0 : i32
    %c0_i32_1 = arith.constant 0 : i32
    return %c0_i32, %c0_i32_0 : i32, i32
  }
  func.func @transform_5(%arg0: i32, %arg1: i32) -> (i32, i32) {
    %c0_i32 = arith.constant 0 : i32
    %c0_i32_0 = arith.constant 0 : i32
    %c0_i32_1 = arith.constant 0 : i32
    return %c0_i32, %c0_i32_0 : i32, i32
  }
  func.func @transform_6(%arg0: i32, %arg1: i32) -> (i32, i32) {
    %c0_i32 = arith.constant 0 : i32
    %c0_i32_0 = arith.constant 0 : i32
    return %arg0, %c0_i32 : i32, i32
  }
  func.func @transform_7(%arg0: i32, %arg1: i32) -> (i32, i32) {
    %c0_i32 = arith.constant 0 : i32
    %c0_i32_0 = arith.constant 0 : i32
    return %arg0, %c0_i32 : i32, i32
  }
}

</mosaic_0001>

<bundles_post_ra>
// kernel: custom_model_forward.1
= control target key start
LH: loop header
LB: loop body
LE: loop exit
PB: predicated region body
PF: predicated region fallthrough
CT: control target
= control target key end

     0   :  { %s1178_s24 = smov 0   ;;  %s1180_s25 = smov 0   ;;  %s1276_s0 = inlined_call_operand.vmem [shape: bf16[8,1024], index: 0, kind: input, shape index: {}]   ;;  %s1277_s1 = inlined_call_operand.vmem [shape: bf16[1024,128], index: 1, kind: input, shape index: {}]   ;;  %s1278_s2 = inlined_call_operand.vmem [shape: f32[1,128], index: 2, kind: input, shape index: {}]   ;;  %s1279_s3 = inlined_call_operand.vmem [shape: bf16[8,32], index: 3, kind: input, shape index: {}]   ;;  %s1280_s4 = inlined_call_operand.vmem [shape: bf16[32,128], index: 4, kind: input, shape index: {}]   ;;  %s1281_s5 = inlined_call_operand.vmem [shape: f32[1,128], index: 5, kind: input, shape index: {}]   ;;  %s1282_s6 = inlined_call_operand.vmem [shape: f32[8,128], index: 6, kind: output, shape index: {0}]   ;;  %s1283_s7 = inlined_call_operand.vmem [shape: f32[8,128], index: 7, kind: output, shape index: {1}]  }
   0x1   :  { %s1182_s26 = smov 0  }
   0x2 LB: > { %s27_s27 = sadd.s32 1, %s1129_s25  ;;  %p935_p0 = scmp.ge.s32.totalorder %s1133_s26, 1  ;;  %s1133_s26 = sphi %s1182_s26, %s18_s26   ;;  %s1129_s25 = sphi %s1180_s25, %s1285_s25   ;;  %s1125_s24 = sphi %s1178_s24, %s1284_s24  }
   0x3   : > { %p28_p1 = scmp.ge.s32.totalorder %s27_s27, 2  ;;  %p279_p2 = scmp.lt.s32.totalorder %s1133_s26, 3 }
   0x5   : > { %s1287_s27 = smov (%p28_p1, %s27_s27), 0  ;;  %p280_p3 = pnand %p935_p0, %p279_p2 }
   0x6   : > { %s936_s28 = sshll.u32 (!%p280_p3), %s1125_s24, 2  ;;  %s938_s29 = sshll.u32 (!%p280_p3), %s1125_s24, 6 }
   0x7   : > { %283 = sbr.rel (%p280_p3) target bundleno = 646 (0x286), region = 44  ;;  %p330_p4 = scmp.lt.s32.totalorder (!%p280_p3), %s936_s28, 7 }
   0x8   : > { %p338_p5 = scmp.lt.s32.totalorder (!%p280_p3), %s938_s29, 127  ;;  %p940_p6 = scmp.ne.s32.totalorder (!%p280_p3), %s1125_s24, 0 }
   0xe   : > { %s1289_s28 = smov (!%p330_p4, %s936_s28), 7  ;;  %s1291_s29 = smov (!%p338_p5, %s938_s29), 127 }
   0xf   : > { %s937_s30 = sshll.u32 %s1289_s28, 2  ;;  %s939_s11 = sshll.u32 %s1291_s29, 2  ;;  %v1135_v0 = vmov (!%p940_p6), 0.0  }
  0x10   : > { %s1203_s10 = scalar_lea.vmem %s1276_s0, %s937_s30  ;;  %s1208_s14 = scalar_lea.vmem %s1277_s1, %s939_s11  ;;  %360 = vst [vmem:[#allocation2] sm:$0xff] (!%p940_p6), %v1135_v0 }
  0x11   : > { %359 = sbr.rel (%p940_p6) target bundleno = 24 (0x18), region = 48 }
  0x18 PF: > { %v1069_v1 = vld [vmem:[%s1208_s14 + $0x40] sm:$0xff]   ;;  %v1073_v5 = vld [vmem:[%s1208_s14 + $0x48] sm:$0xff]   ;;  %v1077_v9 = vld [vmem:[%s1208_s14 + $0x50] sm:$0xff]   ;;  %p977_p7 = scmp.ne.s32.totalorder %s1125_s24, 1 }
  0x19   : > { %v1070_v2 = vld [vmem:[%s1208_s14 + $0xc0] sm:$0xff]   ;;  %987 = vmatprep.subr.bf16.mxu0 %v1069_v1  ;;  %v1074_v6 = vld [vmem:[%s1208_s14 + $0xc8] sm:$0xff]   ;;  %v1078_v10 = vld [vmem:[%s1208_s14 + $0xd0] sm:$0xff]   ;;  %v1136_v53 = vmov (!%p977_p7), 0.0   ;;  %vm1137_vm0 = vmmov (!%p977_p7), 0   ;;  %vm760_vm1 = vcmask (!%p977_p7), 261120  }
  0x1a   : > { %v1071_v3 = vld [vmem:[%s1208_s14] sm:$0xff]   ;;  %1009 = vmatprep.subr.bf16.mxu1 %v1070_v2  ;;  %v1075_v7 = vld [vmem:[%s1208_s14 + $0x8] sm:$0xff]   ;;  %v1079_v11 = vld [vmem:[%s1208_s14 + $0x10] sm:$0xff]  }
  0x1b   : > { %v1072_v4 = vld [vmem:[%s1208_s14 + $0x80] sm:$0xff]   ;;  %988 = vmatpush3.bf16.msra.mxu0 %v1071_v3  ;;  %v1076_v8 = vld [vmem:[%s1208_s14 + $0x88] sm:$0xff]   ;;  %v1080_v12 = vld [vmem:[%s1208_s14 + $0x90] sm:$0xff]  }
  0x1c   : > { %1010 = vmatpush3.bf16.msra.mxu1 %v1072_v4  ;;  %989 = vmatprep.subr.bf16.mxu0 %v1073_v5  ;;  %v1081_v13 = vld [vmem:[%s1208_s14 + $0x58] sm:$0xff]   ;;  %v1085_v17 = vld [vmem:[%s1208_s14 + $0x60] sm:$0xff]   ;;  %v1089_v21 = vld [vmem:[%s1208_s14 + $0x68] sm:$0xff]  }
  0x1d   : > { %1011 = vmatprep.subr.bf16.mxu1 %v1074_v6  ;;  %v1082_v14 = vld [vmem:[%s1208_s14 + $0xd8] sm:$0xff]   ;;  %v1086_v18 = vld [vmem:[%s1208_s14 + $0xe0] sm:$0xff]   ;;  %v1090_v22 = vld [vmem:[%s1208_s14 + $0xe8] sm:$0xff]  }
  0x1e   : > { %v1083_v15 = vld [vmem:[%s1208_s14 + $0x18] sm:$0xff]   ;;  %v1087_v19 = vld [vmem:[%s1208_s14 + $0x20] sm:$0xff]   ;;  %v1091_v23 = vld [vmem:[%s1208_s14 + $0x28] sm:$0xff]  }
  0x1f   : > { %990 = vmatpush3.bf16.msra.mxu0 %v1075_v7  ;;  %v1084_v16 = vld [vmem:[%s1208_s14 + $0x98] sm:$0xff]   ;;  %v1088_v20 = vld [vmem:[%s1208_s14 + $0xa0] sm:$0xff]   ;;  %v1092_v24 = vld [vmem:[%s1208_s14 + $0xa8] sm:$0xff]  }
  0x20   : > { %1012 = vmatpush3.bf16.msra.mxu1 %v1076_v8  ;;  %991 = vmatprep.subr.bf16.mxu0 %v1077_v9  ;;  %v1093_v25 = vld [vmem:[%s1208_s14 + $0x70] sm:$0xff]   ;;  %v1097_v29 = vld [vmem:[%s1208_s14 + $0x78] sm:$0xff]   ;;  %v362_v33 = vld [vmem:[%s1203_s10] sm:$0xff] }
  0x21   : > { %1013 = vmatprep.subr.bf16.mxu1 %v1078_v10  ;;  %v1094_v26 = vld [vmem:[%s1208_s14 + $0xf0] sm:$0xff]   ;;  %v1098_v30 = vld [vmem:[%s1208_s14 + $0xf8] sm:$0xff]   ;;  %v363_v34 = vld [vmem:[%s1203_s10 + $0x8] sm:$0xff]  ;;  %v941_v35 = vcombine.low %v362_v33, %v362_v33  ;;  %v942_v36 = vcombine.high %v362_v33, %v362_v33 }
  0x22   : > { %v1095_v27 = vld [vmem:[%s1208_s14 + $0x30] sm:$0xff]   ;;  %v1099_v31 = vld [vmem:[%s1208_s14 + $0x38] sm:$0xff]   ;;  %v943_v37 = vcombine.low %v363_v34, %v363_v34  ;;  %v944_v38 = vcombine.high %v363_v34, %v363_v34  ;;  %v361_v47 = vld [vmem:[#allocation2] sm:$0xff] }
  0x23   : > { %992 = vmatpush3.bf16.msra.mxu0 %v1079_v11  ;;  %v1096_v28 = vld [vmem:[%s1208_s14 + $0xb0] sm:$0xff]   ;;  %v1100_v32 = vld [vmem:[%s1208_s14 + $0xb8] sm:$0xff]   ;;  %666 = vmatprep.mubr.bf16.mxu0 %v942_v36  ;;  %v1105_v52 = vld [vmem:[%s1280_s4] sm:$0xff] (!%p977_p7)  }
  0x24   : > { %1014 = vmatpush3.bf16.msra.mxu1 %v1080_v12  ;;  %993 = vmatprep.subr.bf16.mxu0 %v1081_v13  ;;  %v1106_v54 = vld [vmem:[%s1280_s4 + $0x8] sm:$0xff] (!%p977_p7)   ;;  %v736_v55 = vld [vmem:[%s1279_s3] sm:$0xf] (!%p977_p7) }
  0x25   : > { %1015 = vmatprep.subr.bf16.mxu1 %v1082_v14  ;;  %706 = vmatprep.mubr.bf16.mxu1 %v944_v38  ;;  %v978_v57 = vld [vmem:[%s1278_s2] ss:$0 sm:$0xff] (!%p977_p7) }
  0x26   : > { %v979_v60 = vld [vmem:[%s1281_s5] ss:$0 sm:$0xff] (!%p977_p7) }
  0x27   : > { %994 = vmatpush3.bf16.msra.mxu0 %v1083_v15 }
  0x28   : > { %1016 = vmatpush3.bf16.msra.mxu1 %v1084_v16  ;;  %995 = vmatprep.subr.bf16.mxu0 %v1085_v17 }
  0x29   : > { %1017 = vmatprep.subr.bf16.mxu1 %v1086_v18 }
  0x2b   : > { %996 = vmatpush3.bf16.msra.mxu0 %v1087_v19 }
  0x2c   : > { %1018 = vmatpush3.bf16.msra.mxu1 %v1088_v20  ;;  %997 = vmatprep.subr.bf16.mxu0 %v1089_v21 }
  0x2d   : > { %1019 = vmatprep.subr.bf16.mxu1 %v1090_v22 }
  0x2f   : > { %998 = vmatpush3.bf16.msra.mxu0 %v1091_v23 }
  0x30   : > { %1020 = vmatpush3.bf16.msra.mxu1 %v1092_v24  ;;  %999 = vmatprep.subr.bf16.mxu0 %v1093_v25 }
  0x31   : > { %1021 = vmatprep.subr.bf16.mxu1 %v1094_v26 }
  0x33   : > { %1000 = vmatpush3.bf16.msra.mxu0 %v1095_v27 }
  0x34   : > { %1022 = vmatpush3.bf16.msra.mxu1 %v1096_v28  ;;  %1001 = vmatprep.subr.bf16.mxu0 %v1097_v29 }
  0x35   : > { %1023 = vmatprep.subr.bf16.mxu1 %v1098_v30 }
  0x37   : > { %1002 = vmatpush3.bf16.msra.mxu0 %v1099_v31 }
  0x38   : > { %1024 = vmatpush3.bf16.msra.mxu1 %v1100_v32  ;;  %1034 = vmatprep.subr.bf16.mxu0 (!%p977_p7), %v1136_v53 }
  0x3a   : > { %667 = vmatmul.mubr.bf16.vlgmr.msra.gmra.mrb[0].mxu0 %v941_v35 }
  0x3b   : > { %707 = vmatmul.mubr.bf16.vlgmr.msra.gmra.mrb[0].mxu1 %v943_v37  ;;  %1035 = vmatpush3.bf16.msra.mxu0 (!%p977_p7), %v1105_v52 }
  0x3c   : > { %1038 = vmatprep.mubr.msk.bf16.mxu0 (!%p977_p7), %vm1137_vm0, %v1136_v53  ;;  %1036 = vmatprep.subr.bf16.mxu0 (!%p977_p7), %v1136_v53 }
  0x3f   : > { %1037 = vmatpush3.bf16.msra.mxu0 (!%p977_p7), %v1106_v54 }
 0x10d   : > { %v1003_v39 = vpop.f32.mrb[0].mxu0 }
 0x10e   : > { %v1025_v40 = vpop.f32.mrb[0].mxu1  ;;  %v1004_v41 = vpop.f32.mrb[1].mxu0 }
 0x10f   : > { %v1026_v42 = vpop.f32.mrb[1].mxu1  ;;  %v1005_v43 = vadd.f32 %v1004_v41, %v1003_v39  ;;  %v1006_v45 = vpop.f32.mrb[2].mxu0 }
 0x110   : > { %v1027_v44 = vadd.f32 %v1026_v42, %v1025_v40  ;;  %v1028_v46 = vpop.f32.mrb[2].mxu1  ;;  %v1007_v48 = vpop.f32.mrb[3].mxu0  ;;  %719 = sbr.rel (%p977_p7) target bundleno = 646 (0x286), region = 52  ;;  %1039 = vmatmul.mubr.msk.bf16.vlgmr.msra.gmra.mrb[0].mxu0 (!%p977_p7), %vm760_vm1, %v736_v55 }
 0x111   : > { %v1029_v49 = vpop.f32.mrb[3].mxu1 }
 0x112   : > { %v709_v50 = vadd.f32 %v1027_v44, %v1005_v43 }
 0x114   : > { %v714_v51 = vadd.f32 %v709_v50, %v361_v47 }
 0x116   : > { %715 = vst [vmem:[#allocation2] sm:$0xff] %v714_v51 }
 0x11d   : > { %v720_v56 = vld [vmem:[#allocation2] sm:$0xff] }
 0x11e   : > { %v728_v58 = vadd.f32 %v978_v57, %v720_v56 }
 0x120   : > { %v729_v59 = vmul.f32 %v728_v58, %v728_v58 }
 0x122   : > { %730 = vadd.xlane.f32.xlu0 %v729_v59 }
 0x1af   : > { %v731_v3 = vpop.xlane.xlu0 %730 }
 0x1b0   : > { %v732_v4 = vmax.f32 %v731_v3, 1e-30 }
 0x1b2   : > { %1107 = vrsqrt.f32 %v732_v4 }
 0x1bc   : > { %v1108_v5 = vpop.eup %1107 }
 0x1bd   : > { %v734_v6 = vmul.f32 %v1108_v5, %v728_v58 }
 0x1bf   : > { %735 = vst [vmem:[%s1282_s6] sm:$0xff] %v734_v6 }
 0x1e3   : > { %v798_v61 = vpop.f32.mrb[0].mxu0 }
 0x1e4   : > { %v799_v62 = vadd.f32 %v979_v60, %v798_v61  ;;  %v1040_v63 = vpop.f32.mrb[1].mxu0 }
 0x1e5   : > { %v801_v0 = vpop.f32.mrb[2].mxu0 }
 0x1e6   : > { %v1041_v1 = vpop.f32.mrb[3].mxu0  ;;  %v804_v2 = vmul.f32 %v799_v62, %v799_v62 }
 0x1e8   : > { %805 = vadd.xlane.f32.xlu0 %v804_v2 }
 0x275   : > { %v806_v7 = vpop.xlane.xlu0 %805 }
 0x276   : > { %v807_v8 = vmax.f32 %v806_v7, 1e-30 }
 0x278   : > { %1109 = vrsqrt.f32 %v807_v8 }
 0x282   : > { %v1110_v9 = vpop.eup %1109 }
 0x283   : > { %v809_v10 = vmul.f32 %v1110_v9, %v799_v62 }
 0x285   : > { %810 = vst [vmem:[%s1283_s7] sm:$0xff] %v809_v10 }
 0x286 PF: > { %s18_s26 = sadd.s32 1, %s1133_s26   ;;  %s1284_s24 = smov %s1129_s25 }
 0x287   : > { %p15_p8 = scmp.ge.s32.totalorder %s18_s26, 4   ;;  %s1285_s25 = smov %s1287_s27 }
 0x289   :  { %17 = sbr.rel (!%p15_p8) target bundleno = 2 (0x2), region = 100 }

</bundles_post_ra>
